<compile_context>
chip_gen: v7x
topology: tpu7x:2x2x1
jax: 0.10.0
libtpu: 0.0.40
codegen_flags: <defaults>
</compile_context>

<pallas_src>
import math
from functools import partial

import jax
import jax.numpy as jnp
from jax.experimental import pallas as pl
from jax.experimental.pallas import tpu as pltpu


def _softmax_lastdim(s):
    m = jnp.max(s, axis=-1, keepdims=True)
    e = jnp.exp(s - m)
    return e / jnp.sum(e, axis=-1, keepdims=True)


def _self_attention_kernel(wq_ref, wo_ref, x_ref, mrow_ref, mcol_ref, out_ref,
                           *, num_heads, block_b):
    # wq_ref, wo_ref : (D, D)      weights (same block every grid step)
    # x_ref          : (Bt, D, L)  activations, native dtype (cast after load)
    # mrow_ref       : (Bt, 1, L)  key mask
    # mcol_ref       : (Bt, L, 1)  query mask
    # out_ref        : (Bt, D, L)
    wq = wq_ref[...].astype(jnp.float32)
    wo = wo_ref[...].astype(jnp.float32)

    d = wq.shape[0]
    dk = d // num_heads
    scale = jnp.float32(1.0 / math.sqrt(dk))

    for b in range(block_b):                       # static unroll over the block
        xb = x_ref[b].astype(jnp.float32)          # (D, L)
        kmask = mrow_ref[b] != 0                   # (1, L) bool, key mask
        qmask = mcol_ref[b] != 0                   # (L, 1) bool, query mask

        # Shared projection (original forward reuses Wqs for Q, K and V).
        p = jnp.dot(wq, xb, preferred_element_type=jnp.float32)   # (D, L)

        z_parts = []
        for h in range(num_heads):                 # static unroll over heads
            ph = p[h * dk:(h + 1) * dk, :]         # (Dk, L), sublane-aligned slice
            # scores: rows = queries, cols = keys
            s = jnp.einsum('dq,dk->qk', ph, ph,
                           preferred_element_type=jnp.float32) * scale
            s = jnp.where(kmask, s, -1e30)         # mask_logits over keys
            s = jnp.where(qmask, s, 0.0)           # * query-mask (orig. semantics)
            a = _softmax_lastdim(s)                # (L, L)
            # Z_h = P_h @ A^T  ==  (A @ V_h)^T  with V_h = P_h^T
            z_parts.append(jnp.einsum('dk,qk->dq', ph, a,
                                      preferred_element_type=jnp.float32))
        z = jnp.concatenate(z_parts, axis=0)       # (D, L), head-concatenated
        out_ref[b] = jnp.dot(wo, z,
                             preferred_element_type=jnp.float32).astype(out_ref.dtype)


def _choose_block_b(B, D, L, itemsize):
    """Largest divisor of B keeping >=2 grid steps (megacore on v7x) and a
    modest per-step footprint (double-buffers comfortably in v7x's 64 MiB)."""
    budget = 2 * 1024 * 1024        # bytes of x per block
    best = 1
    for cand in range(1, B + 1):
        if B % cand:
            continue
        if B >= 2 and B // cand < 2:
            continue
        if cand * D * L * itemsize <= budget:
            best = cand
    return best


def self_attention_forward(x, mask, wq, wo, num_heads, block_b=None):
    """x: (B, D, L); mask: (B, L); wq, wo: (D, D). Returns (B, D, L)."""
    B, D, L = x.shape
    assert D % num_heads == 0
    if block_b is None:
        block_b = _choose_block_b(B, D, L, jnp.dtype(x.dtype).itemsize)
    assert B % block_b == 0
    grid = (B // block_b,)

    # Mask in both layouts so the kernel never relayouts lanes <-> sublanes.
    mrow = mask.reshape(B, 1, L)
    mcol = mask.reshape(B, L, 1)

    kernel = partial(_self_attention_kernel,
                     num_heads=num_heads, block_b=block_b)

    grid_spec = pltpu.PrefetchScalarGridSpec(
        num_scalar_prefetch=0,
        grid=grid,
        in_specs=[
            pl.BlockSpec((D, D), lambda i: (0, 0)),              # Wq
            pl.BlockSpec((D, D), lambda i: (0, 0)),              # Wo
            pl.BlockSpec((block_b, D, L), lambda i: (i, 0, 0)),  # x
            pl.BlockSpec((block_b, 1, L), lambda i: (i, 0, 0)),  # key mask
            pl.BlockSpec((block_b, L, 1), lambda i: (i, 0, 0)),  # query mask
        ],
        out_specs=pl.BlockSpec((block_b, D, L), lambda i: (i, 0, 0)),
    )

    return pl.pallas_call(
        kernel,
        out_shape=jax.ShapeDtypeStruct((B, D, L), x.dtype),
        grid_spec=grid_spec,
        compiler_params=pltpu.CompilerParams(
            dimension_semantics=("parallel",),
            vmem_limit_bytes=48 * 1024 * 1024,
        ),
    )(wq, wo, x, mrow, mcol)


def self_attention_reference(x, mask, wq, wo, num_heads):
    """Pure-JAX reference mirroring the PyTorch forward (incl. Wqs reuse)."""
    B, D, L = x.shape
    dk = D // num_heads
    scale = 1.0 / math.sqrt(dk)
    xt = jnp.swapaxes(x, 1, 2)                                       # (B, L, D)
    proj = xt @ wq.T                                                 # Wqs(x)
    heads = jnp.swapaxes(proj.reshape(B, L, num_heads, dk), 1, 2)    # (B, Nh, L, dk)
    qk = scale * jnp.einsum('bhqd,bhkd->bhqk', heads, heads)
    hmask = mask[:, None, None, :]                                   # (B, 1, 1, L)
    logits = qk * hmask + (1 - hmask) * -1e30
    logits = logits * jnp.swapaxes(hmask, 2, 3)
    a = jax.nn.softmax(logits, axis=-1)
    qkv = jnp.einsum('bhqk,bhkd->bhqd', a, heads)
    qkv = jnp.swapaxes(qkv, 1, 2).reshape(B, L, D)
    out = qkv @ wo.T
    return jnp.swapaxes(out, 1, 2)                                   # (B, D, L)


if __name__ == "__main__":
    # Small shapes consistent with the module: D = connector_dim, Nh = num_heads.
    B, D, L, Nh = 2, 32, 16, 4

    key = jax.random.PRNGKey(0)
    k_x, k_mask, k_wq, k_wk, k_wv, k_wo = jax.random.split(key, 6)

    # Xavier-uniform init for the (D, D) Linear weights (gain = 1).
    bound = math.sqrt(6.0 / (D + D))
    wq = jax.random.uniform(k_wq, (D, D), jnp.float32, -bound, bound)
    wo = jax.random.uniform(k_wo, (D, D), jnp.float32, -bound, bound)
    # Wks / Wvs exist in the module but the original forward never uses them,
    # so they are not needed for the forward pass.

    x = jax.random.normal(k_x, (B, D, L), jnp.float32)
    mask = (jax.random.uniform(k_mask, (B, L)) > 0.25).astype(jnp.float32)

    out = self_attention_forward(x, mask, wq, wo, Nh)
    jax.block_until_ready(out)

    ref = self_attention_reference(x, mask, wq, wo, Nh)
    assert out.shape == (B, D, L)
    assert jnp.allclose(out, ref, atol=1e-3, rtol=1e-3)

    print("KERNEL_OK")
</pallas_src>

<mosaic_0001>
module attributes {stable_mosaic.version = 11 : i64} {
  func.func @_self_attention_kernel(%arg0: i32, %arg1: memref<32x32xf32, #tpu.memory_space<vmem>>, %arg2: memref<32x32xf32, #tpu.memory_space<vmem>>, %arg3: memref<1x32x16xf32, #tpu.memory_space<vmem>>, %arg4: memref<1x1x16xf32, #tpu.memory_space<vmem>>, %arg5: memref<1x16x1xf32, #tpu.memory_space<vmem>>, %arg6: memref<1x32x16xf32, #tpu.memory_space<vmem>>) attributes {dimension_semantics = [#tpu.dimension_semantics<parallel>], iteration_bounds = array<i64: 2>, scalar_prefetch = 0 : i64, scratch_operands = 0 : i64, tpu.core_type = #tpu.core_type<tc>, window_params = [{pipeline_mode = #tpu.pipeline_mode<synchronous>, transform_indices = @transform_0, window_bounds = array<i64: 32, 32>}, {pipeline_mode = #tpu.pipeline_mode<synchronous>, transform_indices = @transform_1, window_bounds = array<i64: 32, 32>}, {transform_indices = @transform_2, window_bounds = array<i64: 1, 32, 16>}, {transform_indices = @transform_3, window_bounds = array<i64: 1, 1, 16>}, {transform_indices = @transform_4, window_bounds = array<i64: 1, 16, 1>}, {transform_indices = @transform_5, window_bounds = array<i64: 1, 32, 16>}]} {
    %c0 = arith.constant 0 : index
    %c0_0 = arith.constant 0 : index
    %0 = vector.load %arg1[%c0, %c0_0] : memref<32x32xf32, #tpu.memory_space<vmem>>, vector<32x32xf32>
    %c0_1 = arith.constant 0 : index
    %c0_2 = arith.constant 0 : index
    %1 = vector.load %arg2[%c0_1, %c0_2] : memref<32x32xf32, #tpu.memory_space<vmem>>, vector<32x32xf32>
    %c0_3 = arith.constant 0 : index
    %c0_4 = arith.constant 0 : index
    %c0_5 = arith.constant 0 : index
    %2 = vector.load %arg3[%c0_3, %c0_4, %c0_5] : memref<1x32x16xf32, #tpu.memory_space<vmem>>, vector<1x32x16xf32>
    %3 = vector.shape_cast %2 : vector<1x32x16xf32> to vector<32x16xf32>
    %c0_6 = arith.constant 0 : index
    %c0_7 = arith.constant 0 : index
    %c0_8 = arith.constant 0 : index
    %4 = vector.load %arg4[%c0_6, %c0_7, %c0_8] : memref<1x1x16xf32, #tpu.memory_space<vmem>>, vector<1x1x16xf32>
    %5 = vector.shape_cast %4 : vector<1x1x16xf32> to vector<1x16xf32>
    %cst = arith.constant 0.000000e+00 : f32
    %6 = vector.broadcast %cst : f32 to vector<1x16xf32>
    %7 = arith.cmpf one, %5, %6 : vector<1x16xf32>
    %c0_9 = arith.constant 0 : index
    %c0_10 = arith.constant 0 : index
    %c0_11 = arith.constant 0 : index
    %8 = vector.load %arg5[%c0_9, %c0_10, %c0_11] : memref<1x16x1xf32, #tpu.memory_space<vmem>>, vector<1x16x1xf32>
    %9 = vector.shape_cast %8 : vector<1x16x1xf32> to vector<16x1xf32>
    %cst_12 = arith.constant 0.000000e+00 : f32
    %10 = vector.broadcast %cst_12 : f32 to vector<16x1xf32>
    %11 = arith.cmpf one, %9, %10 : vector<16x1xf32>
    %cst_13 = arith.constant dense<0.000000e+00> : vector<32x16xf32>
    %12 = tpu.matmul %0, %3, %cst_13 {dimension_numbers = #tpu.dot_dimension_numbers<[1], [0], [0], [1], [0, 0, 1, 1], [], []>} : vector<32x32xf32>, vector<32x16xf32>, vector<32x16xf32> -> vector<32x16xf32>
    %13 = vector.extract_strided_slice %12 {offsets = [0, 0], sizes = [8, 16], strides = [1, 1]} : vector<32x16xf32> to vector<8x16xf32>
    "tpu.trace_start"() <{level = 10 : i32, message = "dq,dk->qk"}> : () -> ()
    %cst_14 = arith.constant dense<0.000000e+00> : vector<16x16xf32>
    %14 = tpu.matmul %13, %13, %cst_14 {dimension_numbers = #tpu.dot_dimension_numbers<[0], [0], [1], [1], [0, 1, 1, 1], [], []>} : vector<8x16xf32>, vector<8x16xf32>, vector<16x16xf32> -> vector<16x16xf32>
    "tpu.trace_stop"() : () -> ()
    %cst_15 = arith.constant 0.353553385 : f32
    %15 = vector.broadcast %cst_15 : f32 to vector<16x16xf32>
    %16 = arith.mulf %14, %15 : vector<16x16xf32>
    %cst_16 = arith.constant -1.000000e+30 : f32
    %17 = vector.shape_cast %7 : vector<1x16xi1> to vector<1x16xi1>
    %18 = vector.broadcast %17 : vector<1x16xi1> to vector<16x16xi1>
    %19 = vector.broadcast %cst_16 : f32 to vector<16x16xf32>
    %20 = arith.select %18, %16, %19 : vector<16x16xi1>, vector<16x16xf32>
    %cst_17 = arith.constant 0.000000e+00 : f32
    %21 = vector.shape_cast %11 : vector<16x1xi1> to vector<16x1xi1>
    %22 = vector.broadcast %21 : vector<16x1xi1> to vector<16x16xi1>
    %23 = vector.broadcast %cst_17 : f32 to vector<16x16xf32>
    %24 = arith.select %22, %20, %23 : vector<16x16xi1>, vector<16x16xf32>
    %cst_18 = arith.constant dense<0xFF800000> : vector<16xf32>
    %25 = vector.multi_reduction <maximumf>, %24, %cst_18 [1] : vector<16x16xf32> to vector<16xf32>
    %26 = vector.shape_cast %25 : vector<16xf32> to vector<16x1xf32>
    %27 = vector.broadcast %26 : vector<16x1xf32> to vector<16x16xf32>
    %28 = arith.subf %24, %27 : vector<16x16xf32>
    %29 = math.exp %28 : vector<16x16xf32>
    %cst_19 = arith.constant dense<0.000000e+00> : vector<16xf32>
    %30 = vector.multi_reduction <add>, %29, %cst_19 [1] : vector<16x16xf32> to vector<16xf32>
    %31 = vector.shape_cast %30 : vector<16xf32> to vector<16x1xf32>
    %32 = vector.broadcast %31 : vector<16x1xf32> to vector<16x16xf32>
    %33 = arith.divf %29, %32 : vector<16x16xf32>
    "tpu.trace_start"() <{level = 10 : i32, message = "dk,qk->dq"}> : () -> ()
    %cst_20 = arith.constant dense<0.000000e+00> : vector<8x16xf32>
    %34 = tpu.matmul %13, %33, %cst_20 {dimension_numbers = #tpu.dot_dimension_numbers<[1], [1], [0], [0], [0, 0, 1, 0], [], []>} : vector<8x16xf32>, vector<16x16xf32>, vector<8x16xf32> -> vector<8x16xf32>
    "tpu.trace_stop"() : () -> ()
    %35 = vector.extract_strided_slice %12 {offsets = [8, 0], sizes = [8, 16], strides = [1, 1]} : vector<32x16xf32> to vector<8x16xf32>
    "tpu.trace_start"() <{level = 10 : i32, message = "dq,dk->qk"}> : () -> ()
    %cst_21 = arith.constant dense<0.000000e+00> : vector<16x16xf32>
    %36 = tpu.matmul %35, %35, %cst_21 {dimension_numbers = #tpu.dot_dimension_numbers<[0], [0], [1], [1], [0, 1, 1, 1], [], []>} : vector<8x16xf32>, vector<8x16xf32>, vector<16x16xf32> -> vector<16x16xf32>
    "tpu.trace_stop"() : () -> ()
    %cst_22 = arith.constant 0.353553385 : f32
    %37 = vector.broadcast %cst_22 : f32 to vector<16x16xf32>
    %38 = arith.mulf %36, %37 : vector<16x16xf32>
    %cst_23 = arith.constant -1.000000e+30 : f32
    %39 = vector.shape_cast %7 : vector<1x16xi1> to vector<1x16xi1>
    %40 = vector.broadcast %39 : vector<1x16xi1> to vector<16x16xi1>
    %41 = vector.broadcast %cst_23 : f32 to vector<16x16xf32>
    %42 = arith.select %40, %38, %41 : vector<16x16xi1>, vector<16x16xf32>
    %cst_24 = arith.constant 0.000000e+00 : f32
    %43 = vector.shape_cast %11 : vector<16x1xi1> to vector<16x1xi1>
    %44 = vector.broadcast %43 : vector<16x1xi1> to vector<16x16xi1>
    %45 = vector.broadcast %cst_24 : f32 to vector<16x16xf32>
    %46 = arith.select %44, %42, %45 : vector<16x16xi1>, vector<16x16xf32>
    %cst_25 = arith.constant dense<0xFF800000> : vector<16xf32>
    %47 = vector.multi_reduction <maximumf>, %46, %cst_25 [1] : vector<16x16xf32> to vector<16xf32>
    %48 = vector.shape_cast %47 : vector<16xf32> to vector<16x1xf32>
    %49 = vector.broadcast %48 : vector<16x1xf32> to vector<16x16xf32>
    %50 = arith.subf %46, %49 : vector<16x16xf32>
    %51 = math.exp %50 : vector<16x16xf32>
    %cst_26 = arith.constant dense<0.000000e+00> : vector<16xf32>
    %52 = vector.multi_reduction <add>, %51, %cst_26 [1] : vector<16x16xf32> to vector<16xf32>
    %53 = vector.shape_cast %52 : vector<16xf32> to vector<16x1xf32>
    %54 = vector.broadcast %53 : vector<16x1xf32> to vector<16x16xf32>
    %55 = arith.divf %51, %54 : vector<16x16xf32>
    "tpu.trace_start"() <{level = 10 : i32, message = "dk,qk->dq"}> : () -> ()
    %cst_27 = arith.constant dense<0.000000e+00> : vector<8x16xf32>
    %56 = tpu.matmul %35, %55, %cst_27 {dimension_numbers = #tpu.dot_dimension_numbers<[1], [1], [0], [0], [0, 0, 1, 0], [], []>} : vector<8x16xf32>, vector<16x16xf32>, vector<8x16xf32> -> vector<8x16xf32>
    "tpu.trace_stop"() : () -> ()
    %57 = vector.extract_strided_slice %12 {offsets = [16, 0], sizes = [8, 16], strides = [1, 1]} : vector<32x16xf32> to vector<8x16xf32>
    "tpu.trace_start"() <{level = 10 : i32, message = "dq,dk->qk"}> : () -> ()
    %cst_28 = arith.constant dense<0.000000e+00> : vector<16x16xf32>
    %58 = tpu.matmul %57, %57, %cst_28 {dimension_numbers = #tpu.dot_dimension_numbers<[0], [0], [1], [1], [0, 1, 1, 1], [], []>} : vector<8x16xf32>, vector<8x16xf32>, vector<16x16xf32> -> vector<16x16xf32>
    "tpu.trace_stop"() : () -> ()
    %cst_29 = arith.constant 0.353553385 : f32
    %59 = vector.broadcast %cst_29 : f32 to vector<16x16xf32>
    %60 = arith.mulf %58, %59 : vector<16x16xf32>
    %cst_30 = arith.constant -1.000000e+30 : f32
    %61 = vector.shape_cast %7 : vector<1x16xi1> to vector<1x16xi1>
    %62 = vector.broadcast %61 : vector<1x16xi1> to vector<16x16xi1>
    %63 = vector.broadcast %cst_30 : f32 to vector<16x16xf32>
    %64 = arith.select %62, %60, %63 : vector<16x16xi1>, vector<16x16xf32>
    %cst_31 = arith.constant 0.000000e+00 : f32
    %65 = vector.shape_cast %11 : vector<16x1xi1> to vector<16x1xi1>
    %66 = vector.broadcast %65 : vector<16x1xi1> to vector<16x16xi1>
    %67 = vector.broadcast %cst_31 : f32 to vector<16x16xf32>
    %68 = arith.select %66, %64, %67 : vector<16x16xi1>, vector<16x16xf32>
    %cst_32 = arith.constant dense<0xFF800000> : vector<16xf32>
    %69 = vector.multi_reduction <maximumf>, %68, %cst_32 [1] : vector<16x16xf32> to vector<16xf32>
    %70 = vector.shape_cast %69 : vector<16xf32> to vector<16x1xf32>
    %71 = vector.broadcast %70 : vector<16x1xf32> to vector<16x16xf32>
    %72 = arith.subf %68, %71 : vector<16x16xf32>
    %73 = math.exp %72 : vector<16x16xf32>
    %cst_33 = arith.constant dense<0.000000e+00> : vector<16xf32>
    %74 = vector.multi_reduction <add>, %73, %cst_33 [1] : vector<16x16xf32> to vector<16xf32>
    %75 = vector.shape_cast %74 : vector<16xf32> to vector<16x1xf32>
    %76 = vector.broadcast %75 : vector<16x1xf32> to vector<16x16xf32>
    %77 = arith.divf %73, %76 : vector<16x16xf32>
    "tpu.trace_start"() <{level = 10 : i32, message = "dk,qk->dq"}> : () -> ()
    %cst_34 = arith.constant dense<0.000000e+00> : vector<8x16xf32>
    %78 = tpu.matmul %57, %77, %cst_34 {dimension_numbers = #tpu.dot_dimension_numbers<[1], [1], [0], [0], [0, 0, 1, 0], [], []>} : vector<8x16xf32>, vector<16x16xf32>, vector<8x16xf32> -> vector<8x16xf32>
    "tpu.trace_stop"() : () -> ()
    %79 = vector.extract_strided_slice %12 {offsets = [24, 0], sizes = [8, 16], strides = [1, 1]} : vector<32x16xf32> to vector<8x16xf32>
    "tpu.trace_start"() <{level = 10 : i32, message = "dq,dk->qk"}> : () -> ()
    %cst_35 = arith.constant dense<0.000000e+00> : vector<16x16xf32>
    %80 = tpu.matmul %79, %79, %cst_35 {dimension_numbers = #tpu.dot_dimension_numbers<[0], [0], [1], [1], [0, 1, 1, 1], [], []>} : vector<8x16xf32>, vector<8x16xf32>, vector<16x16xf32> -> vector<16x16xf32>
    "tpu.trace_stop"() : () -> ()
    %cst_36 = arith.constant 0.353553385 : f32
    %81 = vector.broadcast %cst_36 : f32 to vector<16x16xf32>
    %82 = arith.mulf %80, %81 : vector<16x16xf32>
    %cst_37 = arith.constant -1.000000e+30 : f32
    %83 = vector.shape_cast %7 : vector<1x16xi1> to vector<1x16xi1>
    %84 = vector.broadcast %83 : vector<1x16xi1> to vector<16x16xi1>
    %85 = vector.broadcast %cst_37 : f32 to vector<16x16xf32>
    %86 = arith.select %84, %82, %85 : vector<16x16xi1>, vector<16x16xf32>
    %cst_38 = arith.constant 0.000000e+00 : f32
    %87 = vector.shape_cast %11 : vector<16x1xi1> to vector<16x1xi1>
    %88 = vector.broadcast %87 : vector<16x1xi1> to vector<16x16xi1>
    %89 = vector.broadcast %cst_38 : f32 to vector<16x16xf32>
    %90 = arith.select %88, %86, %89 : vector<16x16xi1>, vector<16x16xf32>
    %cst_39 = arith.constant dense<0xFF800000> : vector<16xf32>
    %91 = vector.multi_reduction <maximumf>, %90, %cst_39 [1] : vector<16x16xf32> to vector<16xf32>
    %92 = vector.shape_cast %91 : vector<16xf32> to vector<16x1xf32>
    %93 = vector.broadcast %92 : vector<16x1xf32> to vector<16x16xf32>
    %94 = arith.subf %90, %93 : vector<16x16xf32>
    %95 = math.exp %94 : vector<16x16xf32>
    %cst_40 = arith.constant dense<0.000000e+00> : vector<16xf32>
    %96 = vector.multi_reduction <add>, %95, %cst_40 [1] : vector<16x16xf32> to vector<16xf32>
    %97 = vector.shape_cast %96 : vector<16xf32> to vector<16x1xf32>
    %98 = vector.broadcast %97 : vector<16x1xf32> to vector<16x16xf32>
    %99 = arith.divf %95, %98 : vector<16x16xf32>
    "tpu.trace_start"() <{level = 10 : i32, message = "dk,qk->dq"}> : () -> ()
    %cst_41 = arith.constant dense<0.000000e+00> : vector<8x16xf32>
    %100 = tpu.matmul %79, %99, %cst_41 {dimension_numbers = #tpu.dot_dimension_numbers<[1], [1], [0], [0], [0, 0, 1, 0], [], []>} : vector<8x16xf32>, vector<16x16xf32>, vector<8x16xf32> -> vector<8x16xf32>
    "tpu.trace_stop"() : () -> ()
    %101 = tpu.concatenate %34, %56, %78, %100 in 0 : vector<8x16xf32>, vector<8x16xf32>, vector<8x16xf32>, vector<8x16xf32> -> vector<32x16xf32>
    %cst_42 = arith.constant dense<0.000000e+00> : vector<32x16xf32>
    %102 = tpu.matmul %1, %101, %cst_42 {dimension_numbers = #tpu.dot_dimension_numbers<[1], [0], [0], [1], [0, 0, 1, 1], [], []>} : vector<32x32xf32>, vector<32x16xf32>, vector<32x16xf32> -> vector<32x16xf32>
    %c0_43 = arith.constant 0 : index
    %c0_44 = arith.constant 0 : index
    %c0_45 = arith.constant 0 : index
    %103 = vector.load %arg6[%c0_43, %c0_44, %c0_45] : memref<1x32x16xf32, #tpu.memory_space<vmem>>, vector<1x32x16xf32>
    %104 = vector.shape_cast %103 : vector<1x32x16xf32> to vector<32x16xf32>
    %105 = vector.shape_cast %102 : vector<32x16xf32> to vector<1x32x16xf32>
    tpu.vector_store %arg6[%c0_43, %c0_44, %c0_45], %105 {strides = array<i32>} : memref<1x32x16xf32, #tpu.memory_space<vmem>>, vector<1x32x16xf32>,
    return
  }
  func.func @transform_0(%arg0: i32) -> (i32, i32) {
    %c0_i32 = arith.constant 0 : i32
    %c0_i32_0 = arith.constant 0 : i32
    %c0_i32_1 = arith.constant 0 : i32
    return %c0_i32, %c0_i32_0 : i32, i32
  }
  func.func @transform_1(%arg0: i32) -> (i32, i32) {
    %c0_i32 = arith.constant 0 : i32
    %c0_i32_0 = arith.constant 0 : i32
    %c0_i32_1 = arith.constant 0 : i32
    return %c0_i32, %c0_i32_0 : i32, i32
  }
  func.func @transform_2(%arg0: i32) -> (i32, i32, i32) {
    %c0_i32 = arith.constant 0 : i32
    %c0_i32_0 = arith.constant 0 : i32
    %c0_i32_1 = arith.constant 0 : i32
    return %arg0, %c0_i32, %c0_i32_0 : i32, i32, i32
  }
  func.func @transform_3(%arg0: i32) -> (i32, i32, i32) {
    %c0_i32 = arith.constant 0 : i32
    %c0_i32_0 = arith.constant 0 : i32
    %c0_i32_1 = arith.constant 0 : i32
    return %arg0, %c0_i32, %c0_i32_0 : i32, i32, i32
  }
  func.func @transform_4(%arg0: i32) -> (i32, i32, i32) {
    %c0_i32 = arith.constant 0 : i32
    %c0_i32_0 = arith.constant 0 : i32
    %c0_i32_1 = arith.constant 0 : i32
    return %arg0, %c0_i32, %c0_i32_0 : i32, i32, i32
  }
  func.func @transform_5(%arg0: i32) -> (i32, i32, i32) {
    %c0_i32 = arith.constant 0 : i32
    %c0_i32_0 = arith.constant 0 : i32
    %c0_i32_1 = arith.constant 0 : i32
    return %arg0, %c0_i32, %c0_i32_0 : i32, i32, i32
  }
}

</mosaic_0001>

<bundles_post_ra>
// kernel: tpu_custom_call.1
= control target key start
LH: loop header
LB: loop body
LE: loop exit
PB: predicated region body
PF: predicated region fallthrough
CT: control target
= control target key end

     0   :  { %s1730_s18 = smov 0   ;;  %s1920_s0 = inlined_call_operand.vmem [shape: f32[32,32], index: 0, kind: input, shape index: {}]   ;;  %s1921_s1 = inlined_call_operand.vmem [shape: f32[32,32], index: 1, kind: input, shape index: {}]   ;;  %s1922_s2 = inlined_call_operand.vmem [shape: f32[2,32,16], index: 2, kind: input, shape index: {}]   ;;  %s1923_s3 = inlined_call_operand.vmem [shape: f32[2,1,16], index: 3, kind: input, shape index: {}]   ;;  %s1924_s4 = inlined_call_operand.vmem [shape: f32[2,16,1], index: 4, kind: input, shape index: {}]   ;;  %s1925_s5 = inlined_call_operand.vmem [shape: f32[2,32,16], index: 5, kind: output, shape index: {}]  }
   0x1 LB: > { %s1450_s19 = sadd.s32 4294967295, %s1694_s18   ;;  %p1454_p0 = scmp.ge.s32.totalorder %s1694_s18, 1  ;;  %s1694_s18 = sphi %s1730_s18, %s15_s18  }
   0x2   : > { %p205_p1 = scmp.lt.s32.totalorder %s1694_s18, 3 }
   0x4   : > { %p206_p2 = pnand %p1454_p0, %p205_p1 }
   0x5   : > { %p241_p3 = scmp.lt.s32.totalorder (!%p206_p2), %s1450_s19, 1  ;;  %v259_v0 = vld [vmem:[%s1920_s0] sm:$0xff] (!%p206_p2)  ;;  %vm277_vm0 = vcmask (!%p206_p2), 261120   ;;  %v260_v7 = vld [vmem:[%s1920_s0 + $0x8] sm:$0xff] (!%p206_p2)  ;;  %v1696_v8 = vmov (!%p206_p2), 0   ;;  %vm407_vm3 = vcmask (!%p206_p2), 64512   ;;  %v492_v19 = vlaneseq (!%p206_p2) }
   0x6   : > { %209 = sbr.rel (%p206_p2) target bundleno = 1924 (0x784), region = 40  ;;  %1542 = vmatprep.mubr.msk.f32.mxu0 (!%p206_p2), %vm277_vm0, %v259_v0  ;;  %1655 = vset.pattern.permute.xlu1 (!%p206_p2), %v1696_v8  ;;  %v261_v17 = vld [vmem:[%s1920_s0 + $0x10] sm:$0xff] (!%p206_p2)  ;;  %v262_v18 = vld [vmem:[%s1920_s0 + $0x18] sm:$0xff] (!%p206_p2)  ;;  %vm511_vm7 = vcmask (!%p206_p2), 130048   ;;  %v1697_v49 = vmov (!%p206_p2), 0.0|0.0   ;;  %vm1698_vm9 = vmmov (!%p206_p2), 0  }
   0x7   : > { %v493_v21 = vshrl.u32 (!%p206_p2), %v492_v19, 7  ;;  %v1699_v50 = vmov (!%p206_p2), 0.0   ;;  %vm1815_vm10 = vmpackc.low (!%p206_p2), %vm511_vm7, %vm511_vm7 }
   0x9   : > { %v494_v22 = vsub.s32 (!%p206_p2), 0, %v493_v21 }
   0xd   : > { %s1929_s19 = smov (!%p241_p3, %s1450_s19), 1 }
   0xe   : > { %s1491_s22 = sshll.u32 %s1929_s19, 5  ;;  %s1492_s28 = sshll.u32 %s1929_s19, 4 }
   0xf   : > { %s245_s25 = scalar_lea.vmem %s1922_s2, %s1491_s22  ;;  %s253_s6 = scalar_lea.vmem %s1924_s4, %s1492_s28 }
  0x10   : > { %v267_v1 = vld [vmem:[%s245_s25] sm:$0xff]  ;;  %v268_v2 = vld [vmem:[%s245_s25 + $0x8] sm:$0xff]  ;;  %v269_v3 = vld [vmem:[%s245_s25 + $0x10] sm:$0xff]  ;;  %s248_s13 = scalar_lea.vmem %s1923_s3, %s1929_s19  ;;  %s258_s27 = scalar_lea.vmem %s1925_s5, %s1491_s22 }
  0x11   : > { %v1610_v4 = vpack.c.bf16 %v268_v2, %v267_v1  ;;  %v270_v5 = vld [vmem:[%s245_s25 + $0x18] sm:$0xff]  ;;  %v274_v11 = vld [vmem:[%s253_s6 + $0x8] sm:$0xff]  ;;  %v273_v13 = vld [vmem:[%s253_s6] sm:$0xff] }
  0x12   : > { %v1614_v6 = vpack.c.bf16 %v270_v5, %v269_v3  ;;  %vm276_vm1 = vcmp.ne.f32.partialorder %v274_v11, 0.0  ;;  %vm275_vm2 = vcmp.ne.f32.partialorder %v273_v13, 0.0  ;;  %v271_v20 = vld [vmem:[%s248_s13] sm:$0x1] }
  0x13   : > { %1611 = vmatprep.subr.bf16.mxu0 %v1610_v4  ;;  %v500_v12 = vsel %vm276_vm1, 1, %v1696_v8  ;;  %v499_v14 = vsel %vm275_vm2, 1, %v1696_v8  ;;  %vm272_vm4 = vcmp.ne.f32.partialorder %v271_v20, 0.0 }
  0x14   : > { %1613 = vmatpush3.bf16.msra.mxu0 %v1610_v4  ;;  %505 = vperm.xlu1 %1655, %v500_v12   ;;  %v491_v23 = vsel %vm272_vm4, 1, %v1696_v8 }
  0x15   : > { %1615 = vmatprep.subr.bf16.mxu0 %v1614_v6  ;;  %v1780_v24 = vrot.slane %v491_v23, %v494_v22 }
  0x17   : > { %vm496_vm5 = vcmp.eq.s32.totalorder %v1780_v24, 1 }
  0x18   : > { %1617 = vmatpush3.bf16.msra.mxu0 %v1614_v6 }
  0x19   : > { %1622 = vmatprep.subr.bf16.mxu0 %v1697_v49 }
  0x1b   : > { %1543 = vmatmul.mubr.msk.f32.vlgmr.msra.gmra.mrb[0].mxu0 %vm277_vm0, %v260_v7 }
  0x1c   : > { %1545 = vmatprep.mubr.msk.f32.mxu0 %vm277_vm0, %v261_v17 }
  0x1f   : > { %1546 = vmatmul.mubr.msk.f32.gmra.mrb[2].mxu0 %vm277_vm0, %v262_v18 }
  0x20   : > { %1569 = vmatprep.mubr.msk.f32.mxu0 %vm1698_vm9, %v1699_v50 }
  0x93   : > { %v1785_v29 = vpop.permute.xlu1 %505 }
  0x94   : > { %vm508_vm8 = vcmp.eq.s32.totalorder %v1785_v29, 1 }
  0xee   : > { %v1754_v9 = vpop.f32.mrb[0].mxu0 }
  0xef   : > { %v1756_v10 = vpop.f32.mrb[1].mxu0 }
  0xf0   : > { %375 = vxpose.xlu0.b32.start.end [1/1] (short) (narrow) %v1756_v10, 16  ;;  %1548 = vmatprep.subr.mxu1 %v1756_v10 }
  0xf1   : > { %1549 = vmatpush3.msra.mxu1 %v1756_v10 }
  0xf2   : > { %v1799_v37 = vpop.f32.mrb[2].mxu0  ;;  %1618 = vmatprep.subr.bf16.mxu1 %v1697_v49 }
  0xf3   : > { %v1801_v38 = vpop.f32.mrb[3].mxu0 }
 0x119   : > { %1654 = vset.pattern.permute.xlu0 %v1696_v8 }
 0x11d   : > { %502 = vperm.xlu0 %1654, %v499_v14  }
 0x13b   : > { %613 = vxpose.xlu0.b32.start.end [1/1] (short) (narrow) %v1754_v9, 16 }
 0x140   : > { %1053 = vxpose.xlu0.b32.start.end [1/1] (short) (narrow) %v1799_v37, 16 }
 0x170   : > { %v391_v15 = vpop.trf.xlu0 }
 0x171   : > { %1550 = vmatprep.mubr.msk.f32.mxu1 %vm407_vm3, %v391_v15 }
 0x174   : > { %v392_v16 = vpop.trf.xlu0 }
 0x175   : > { %1551 = vmatmul.mubr.msk.f32.vlgmr.msra.gmra.mrb[0].mxu1 %vm407_vm3, %v392_v16 }
 0x176   : > { %1557 = vmatprep.mubr.msk.f32.mxu1 %vm1698_vm9, %v1699_v50 }
 0x19c   : > { %v1782_v25 = vpop.permute.xlu0 %502 }
 0x19d   : > { %vm507_vm6 = vcmp.eq.s32.totalorder %v1782_v25, 1 }
 0x1bb   : > { %v629_v59 = vpop.trf.xlu0 }
 0x1bf   : > { %v630_v60 = vpop.trf.xlu0 }
 0x1c3   : > { %v1069_v62 = vpop.trf.xlu0 }
 0x1c7   : > { %v1070_v0 = vpop.trf.xlu0 }
 0x248   : > { %v1552_v26 = vpop.f32.mrb[0].mxu1 }
 0x249   : > { %v490_v27 = vmul.f32 0.35355338, %v1552_v26  ;;  %v480_v28 = vpop.f32.mrb[1].mxu1 }
 0x24a   : > { %v489_v30 = vmul.f32 0.35355338, %v480_v28 }
 0x24b   : > { %v498_v32 = vsel %vm496_vm5, %v490_v27, -1e+30 }
 0x24c   : > { %v497_v31 = vsel %vm496_vm5, %v489_v30, -1e+30  ;;  %v510_v35 = vsel %vm508_vm8, %v498_v32, 0.0 }
 0x24d   : > { %v509_v33 = vsel %vm507_vm6, %v497_v31, 0.0  ;;  %v515_v36 = vsel %vm511_vm7, %v510_v35, -inf }
 0x24e   : > { %v512_v34 = vsel %vm511_vm7, %v509_v33, -inf }
 0x24f   : > { %513 = vmax.xlane.f32.xlu1 %v512_v34 }
 0x253   : > { %516 = vmax.xlane.f32.xlu1 %v515_v36 }
 0x2dc   : > { %v514_v39 = vpop.xlane.xlu1 %513 }
 0x2dd   : > { %v518_v40 = vsub.f32 %v509_v33, %v514_v39 }
 0x2df   : > { %v520_v41 = vmul.f32 1.442695, %v518_v40 }
 0x2e0   : > { %v517_v42 = vpop.xlane.xlu1 %516 }
 0x2e1   : > { %1656 = vpow2.f32 %v520_v41  ;;  %v519_v43 = vsub.f32 %v510_v35, %v517_v42 }
 0x2e3   : > { %v522_v44 = vmul.f32 1.442695, %v519_v43 }
 0x2e5   : > { %1658 = vpow2.f32 %v522_v44 }
 0x2eb   : > { %v1657_v45 = vpop.eup %1656 }
 0x2ec   : > { %v524_v46 = vsel %vm511_vm7, %v1657_v45, 0.0 }
 0x2ed   : > { %525 = vadd.xlane.f32.xlu1 %v524_v46 }
 0x2ef   : > { %v1659_v47 = vpop.eup %1658 }
 0x2f0   : > { %v527_v48 = vsel %vm511_vm7, %v1659_v47, 0.0 }
 0x2f1   : > { %528 = vadd.xlane.f32.xlu1 %v527_v48 }
 0x324   : > { %833 = vxpose.xlu1.b32.start.end [1/1] (short) (narrow) %v1801_v38, 16 }
 0x37a   : > { %v526_v51 = vpop.xlane.xlu1 %525 }
 0x37b   : > { %1660 = vrcp.f32 %v526_v51 }
 0x37e   : > { %v529_v52 = vpop.xlane.xlu1 %528 }
 0x37f   : > { %1662 = vrcp.f32 %v529_v52 }
 0x385   : > { %v1661_v53 = vpop.eup %1660 }
 0x386   : > { %v531_v55 = vmul.f32 %v1661_v53, %v1657_v45 }
 0x389   : > { %v1663_v54 = vpop.eup %1662 }
 0x38a   : > { %v533_v56 = vmul.f32 %v1663_v54, %v1659_v47 }
 0x38c   : > { %v1619_v58 = vpack.c.bf16 %v533_v56, %v531_v55 }
 0x38e   : > { %1621 = vmatpush3.bf16.xpose.msk.msra.mxu1 %vm1815_vm10, %v1619_v58 }
 0x38f   : > { %1560 = vmatprep.subr.mxu1 %v1754_v9 }
 0x395   : > { %1558 = vmatmul.mubr.msk.f32.vlgmr.msra.gmra.mrb[2].mxu1 %vm511_vm7, %v1756_v10 }
 0x396   : > { %1561 = vmatpush3.msra.mxu1 %v1754_v9  ;;  %1562 = vmatprep.mubr.msk.f32.mxu1 %vm407_vm3, %v629_v59 }
 0x397   : > { %1572 = vmatprep.subr.mxu1 %v1801_v38 }
 0x399   : > { %1563 = vmatmul.mubr.msk.f32.vlgmr.msra.gmra.mrb[4].mxu1 %vm407_vm3, %v630_v60 }
 0x39a   : > { %1573 = vmatpush3.msra.mxu1 %v1801_v38 }
 0x39b   : > { %1584 = vmatprep.subr.mxu1 %v1799_v37 }
 0x3a4   : > { %v849_v61 = vpop.trf.xlu1 }
 0x3a5   : > { %1574 = vmatprep.mubr.msk.f32.mxu1 %vm407_vm3, %v849_v61 }
 0x3a8   : > { %v850_v63 = vpop.trf.xlu1 }
 0x3a9   : > { %1575 = vmatmul.mubr.msk.f32.vlgmr.msra.gmra.mrb[6].mxu1 %vm407_vm3, %v850_v63 }
 0x3aa   : > { %1585 = vmatpush3.msra.mxu1 %v1799_v37  ;;  %1586 = vmatprep.mubr.msk.f32.mxu1 %vm407_vm3, %v1069_v62 }
 0x3ab   : > { %1630 = vmatprep.subr.bf16.mxu1 %v1697_v49 }
 0x3ad   : > { %1587 = vmatmul.mubr.msk.f32.vlgmr.msra.gmra.mrb[8].mxu1 %vm407_vm3, %v1070_v0 }
 0x3ae   : > { %1593 = vmatprep.mubr.msk.f32.mxu1 %vm1698_vm9, %v1699_v50 }
 0x468   : > { %v1838_v1 = vpop.f32.mrb[2].mxu1 }
 0x469   : > { %v1559_v2 = vpop.f32.mrb[3].mxu1 }
 0x46c   : > { %v1564_v3 = vpop.f32.mrb[4].mxu1 }
 0x46d   : > { %v727_v4 = vmul.f32 0.35355338, %v1564_v3  ;;  %v717_v5 = vpop.f32.mrb[5].mxu1 }
 0x46e   : > { %v726_v6 = vmul.f32 0.35355338, %v717_v5 }
 0x46f   : > { %v729_v7 = vsel %vm496_vm5, %v727_v4, -1e+30 }
 0x470   : > { %v731_v8 = vsel %vm508_vm8, %v729_v7, 0.0  ;;  %v728_v10 = vsel %vm496_vm5, %v726_v6, -1e+30 }
 0x471   : > { %v735_v11 = vsel %vm511_vm7, %v731_v8, -inf  ;;  %v730_v12 = vsel %vm507_vm6, %v728_v10, 0.0 }
 0x472   : > { %736 = vmax.xlane.f32.xlu1 %v735_v11  ;;  %v732_v13 = vsel %vm511_vm7, %v730_v12, -inf }
 0x473   : > { %733 = vmax.xlane.f32.xlu0 %v732_v13 }
 0x47c   : > { %v1576_v14 = vpop.f32.mrb[6].mxu1 }
 0x47d   : > { %v947_v15 = vmul.f32 0.35355338, %v1576_v14  ;;  %v937_v16 = vpop.f32.mrb[7].mxu1 }
 0x47e   : > { %v946_v17 = vmul.f32 0.35355338, %v937_v16 }
 0x47f   : > { %v949_v18 = vsel %vm496_vm5, %v947_v15, -1e+30 }
 0x480   : > { %v1588_v19 = vpop.f32.mrb[8].mxu1  ;;  %v951_v20 = vsel %vm508_vm8, %v949_v18, 0.0  ;;  %v948_v21 = vsel %vm496_vm5, %v946_v17, -1e+30 }
 0x481   : > { %v1157_v22 = vpop.f32.mrb[9].mxu1  ;;  %v955_v23 = vsel %vm511_vm7, %v951_v20, -inf  ;;  %v950_v27 = vsel %vm507_vm6, %v948_v21, 0.0  ;;  %v1167_v28 = vmul.f32 0.35355338, %v1588_v19 }
 0x482   : > { %v1166_v26 = vmul.f32 0.35355338, %v1157_v22  ;;  %956 = vmax.xlane.f32.xlu0 %v955_v23  ;;  %v952_v31 = vsel %vm511_vm7, %v950_v27, -inf }
 0x483   : > { %v1169_v33 = vsel %vm496_vm5, %v1167_v28, -1e+30 }
 0x484   : > { %v1168_v30 = vsel %vm496_vm5, %v1166_v26, -1e+30  ;;  %v1171_v35 = vsel %vm508_vm8, %v1169_v33, 0.0 }
 0x485   : > { %v1170_v32 = vsel %vm507_vm6, %v1168_v30, 0.0  ;;  %v1175_v36 = vsel %vm511_vm7, %v1171_v35, -inf }
 0x486   : > { %953 = vmax.xlane.f32.xlu0 %v952_v31  ;;  %v1172_v34 = vsel %vm511_vm7, %v1170_v32, -inf }
 0x48a   : > { %1173 = vmax.xlane.f32.xlu0 %v1172_v34 }
 0x48e   : > { %1176 = vmax.xlane.f32.xlu0 %v1175_v36 }
 0x4ff   : > { %v737_v39 = vpop.xlane.xlu1 %736 }
 0x500   : > { %v739_v40 = vsub.f32 %v731_v8, %v737_v39  ;;  %v734_v41 = vpop.xlane.xlu0 %733 }
 0x501   : > { %v738_v42 = vsub.f32 %v730_v12, %v734_v41 }
 0x502   : > { %v742_v43 = vmul.f32 1.442695, %v739_v40 }
 0x503   : > { %v740_v44 = vmul.f32 1.442695, %v738_v42 }
 0x504   : > { %1664 = vpow2.f32 %v742_v43 }
 0x505   : > { %1666 = vpow2.f32 %v740_v44 }
 0x50e   : > { %v1665_v25 = vpop.eup %1664 }
 0x50f   : > { %v1667_v24 = vpop.eup %1666  ;;  %v957_v45 = vpop.xlane.xlu0 %956  ;;  %v747_v46 = vsel %vm511_vm7, %v1665_v25, 0.0 }
 0x510   : > { %v959_v47 = vsub.f32 %v951_v20, %v957_v45  ;;  %748 = vadd.xlane.f32.xlu0 %v747_v46  ;;  %v744_v29 = vsel %vm511_vm7, %v1667_v24, 0.0 }
 0x511   : > { %745 = vadd.xlane.f32.xlu1 %v744_v29 }
 0x512   : > { %v962_v48 = vmul.f32 1.442695, %v959_v47 }
 0x513   : > { %v954_v51 = vpop.xlane.xlu0 %953 }
 0x514   : > { %1668 = vpow2.f32 %v962_v48  ;;  %v958_v52 = vsub.f32 %v950_v27, %v954_v51 }
 0x516   : > { %v960_v53 = vmul.f32 1.442695, %v958_v52 }
 0x517   : > { %v1174_v54 = vpop.xlane.xlu0 %1173 }
 0x518   : > { %1670 = vpow2.f32 %v960_v53  ;;  %v1178_v55 = vsub.f32 %v1170_v32, %v1174_v54 }
 0x51a   : > { %v1180_v56 = vmul.f32 1.442695, %v1178_v55 }
 0x51b   : > { %v1177_v58 = vpop.xlane.xlu0 %1176 }
 0x51c   : > { %1672 = vpow2.f32 %v1180_v56  ;;  %v1179_v59 = vsub.f32 %v1171_v35, %v1177_v58  ;;  %v265_v35 = vld [vmem:[%s1921_s1 + $0x10] sm:$0xff] }
 0x51e   : > { %v1669_v60 = vpop.eup %1668  ;;  %v1182_v61 = vmul.f32 1.442695, %v1179_v59 }
 0x51f   : > { %v967_v62 = vsel %vm511_vm7, %v1669_v60, 0.0 }
 0x520   : > { %1674 = vpow2.f32 %v1182_v61  ;;  %968 = vadd.xlane.f32.xlu0 %v967_v62 }
 0x522   : > { %v1671_v63 = vpop.eup %1670 }
 0x523   : > { %v964_v0 = vsel %vm511_vm7, %v1671_v63, 0.0 }
 0x524   : > { %965 = vadd.xlane.f32.xlu1 %v964_v0 }
 0x526   : > { %v1673_v2 = vpop.eup %1672 }
 0x527   : > { %v1184_v3 = vsel %vm511_vm7, %v1673_v2, 0.0 }
 0x528   : > { %1185 = vadd.xlane.f32.xlu1 %v1184_v3 }
 0x52a   : > { %v1675_v4 = vpop.eup %1674 }
 0x52b   : > { %v1187_v5 = vsel %vm511_vm7, %v1675_v4, 0.0 }
 0x52c   : > { %1188 = vadd.xlane.f32.xlu0 %v1187_v5 }
 0x59d   : > { %v749_v6 = vpop.xlane.xlu0 %748 }
 0x59e   : > { %1676 = vrcp.f32 %v749_v6  ;;  %v746_v7 = vpop.xlane.xlu1 %745 }
 0x59f   : > { %1678 = vrcp.f32 %v746_v7 }
 0x5a8   : > { %v1677_v8 = vpop.eup %1676 }
 0x5a9   : > { %v1679_v10 = vpop.eup %1678  ;;  %v753_v11 = vmul.f32 %v1677_v8, %v1665_v25 }
 0x5aa   : > { %v751_v12 = vmul.f32 %v1679_v10, %v1667_v24 }
 0x5ac   : > { %v1623_v13 = vpack.c.bf16 %v753_v11, %v751_v12 }
 0x5ad   : > { %v969_v14 = vpop.xlane.xlu0 %968 }
 0x5ae   : > { %1625 = vmatpush3.bf16.xpose.msk.msra.mxu0 %vm1815_vm10, %v1623_v13  ;;  %1680 = vrcp.f32 %v969_v14 }
 0x5af   : > { %1626 = vmatprep.subr.bf16.mxu0 %v1697_v49 }
 0x5b1   : > { %v966_v15 = vpop.xlane.xlu1 %965 }
 0x5b2   : > { %1682 = vrcp.f32 %v966_v15 }
 0x5b5   : > { %v1186_v16 = vpop.xlane.xlu1 %1185  ;;  %1570 = vmatmul.mubr.msk.f32.vlgmr.msra.gmra.mrb[4].mxu0 %vm511_vm7, %v1754_v9  ;;  %v263_v9 = vld [vmem:[%s1921_s1] sm:$0xff] }
 0x5b6   : > { %1581 = vmatprep.mubr.msk.f32.mxu0 %vm1698_vm9, %v1699_v50  ;;  %1684 = vrcp.f32 %v1186_v16 }
 0x5b8   : > { %v1681_v18 = vpop.eup %1680 }
 0x5b9   : > { %v1189_v17 = vpop.xlane.xlu0 %1188  ;;  %v973_v20 = vmul.f32 %v1681_v18, %v1669_v60 }
 0x5ba   : > { %1686 = vrcp.f32 %v1189_v17 }
 0x5bc   : > { %v1683_v19 = vpop.eup %1682 }
 0x5bd   : > { %v971_v21 = vmul.f32 %v1683_v19, %v1671_v63 }
 0x5bf   : > { %v1627_v22 = vpack.c.bf16 %v973_v20, %v971_v21 }
 0x5c0   : > { %v1685_v49 = vpop.eup %1684 }
 0x5c1   : > { %1629 = vmatpush3.bf16.xpose.msk.msra.mxu0 %vm1815_vm10, %v1627_v22  ;;  %v1191_v26 = vmul.f32 %v1685_v49, %v1673_v2 }
 0x5c4   : > { %v1687_v23 = vpop.eup %1686 }
 0x5c5   : > { %v1193_v27 = vmul.f32 %v1687_v23, %v1675_v4 }
 0x5c7   : > { %v1631_v28 = vpack.c.bf16 %v1193_v27, %v1191_v26 }
 0x5c8   : > { %1582 = vmatmul.mubr.msk.f32.vlgmr.msra.gmra.mrb[6].mxu0 %vm511_vm7, %v1801_v38 }
 0x5c9   : > { %1633 = vmatpush3.bf16.xpose.msk.msra.mxu1 %vm1815_vm10, %v1631_v28  ;;  %1604 = vmatprep.mubr.msk.f32.mxu0 %vm277_vm0, %v263_v9 }
 0x5d0   : > { %1594 = vmatmul.mubr.msk.f32.vlgmr.msra.gmra.mrb[10].mxu1 %vm511_vm7, %v1799_v37  ;;  %v264_v37 = vld [vmem:[%s1921_s1 + $0x8] sm:$0xff] }
 0x688   : > { %v829_v50 = vpop.f32.mrb[4].mxu0 }
 0x689   : > { %v1634_v30 = vpack.c.bf16 %v829_v50, %v1838_v1  ;;  %v1571_v31 = vpop.f32.mrb[5].mxu0  ;;  %v266_v1 = vld [vmem:[%s1921_s1 + $0x18] sm:$0xff] }
 0x68b   : > { %1635 = vmatprep.subr.bf16.mxu0 %v1634_v30 }
 0x68c   : > { %1637 = vmatpush3.bf16.msra.mxu0 %v1634_v30 }
 0x69b   : > { %v1049_v38 = vpop.f32.mrb[6].mxu0 }
 0x69c   : > { %v1583_v32 = vpop.f32.mrb[7].mxu0 }
 0x6a3   : > { %v1269_v57 = vpop.f32.mrb[10].mxu1 }
 0x6a4   : > { %v1638_v33 = vpack.c.bf16 %v1269_v57, %v1049_v38  ;;  %v1595_v34 = vpop.f32.mrb[11].mxu1 }
 0x6a6   : > { %1639 = vmatprep.subr.bf16.mxu0 %v1638_v33 }
 0x6a7   : > { %1641 = vmatpush3.bf16.msra.mxu0 %v1638_v33 }
 0x6aa   : > { %1605 = vmatmul.mubr.msk.f32.vlgmr.msra.gmra.mrb[8].mxu0 %vm277_vm0, %v264_v37 }
 0x6ab   : > { %1607 = vmatprep.mubr.msk.f32.mxu0 %vm277_vm0, %v265_v35 }
 0x6ae   : > { %1608 = vmatmul.mubr.msk.f32.gmra.mrb[10].mxu0 %vm277_vm0, %v266_v1 }
 0x77d   : > { %v1606_v36 = vpop.f32.mrb[8].mxu0 }
 0x77e   : > { %1371 = vst.msk [vmem:[%s258_s27 + $0x8] sm:$0xff] %vm511_vm7, %v1606_v36  ;;  %v1351_v39 = vpop.f32.mrb[9].mxu0 }
 0x77f   : > { %1370 = vst.msk [vmem:[%s258_s27] sm:$0xff] %vm511_vm7, %v1351_v39 }
 0x781   : > { %v1609_v40 = vpop.f32.mrb[10].mxu0 }
 0x782   : > { %1373 = vst.msk [vmem:[%s258_s27 + $0x18] sm:$0xff] %vm511_vm7, %v1609_v40  ;;  %v1361_v41 = vpop.f32.mrb[11].mxu0 }
 0x783   : > { %1372 = vst.msk [vmem:[%s258_s27 + $0x10] sm:$0xff] %vm511_vm7, %v1361_v41 }
 0x784 PF: > { %s15_s18 = sadd.s32 1, %s1694_s18  }
 0x785   : > { %p12_p4 = scmp.ge.s32.totalorder %s15_s18, 4  }
 0x787   :  { %14 = sbr.rel (!%p12_p4) target bundleno = 1 (0x1), region = 76 }

</bundles_post_ra>
